<compile_context>
chip_gen: v7x
topology: tpu7x:2x2x1
jax: 0.10.0
libtpu: 0.0.40
codegen_flags: <defaults>
</compile_context>

<pallas_src>
import jax
import jax.numpy as jnp
from jax.experimental import pallas as pl
from jax.experimental.pallas import tpu as pltpu


def _disc_encoder_loss_kernel(base_ref, weather_ref, w1_ref, w2_ref, slab_ref,
                              out_ref):
    # base:    (B, Db)        f32
    # weather: (B, Dw)        f32
    # w1:      (Db+Dw, H)     f32   (layer-1 weight, rows stacked base|weather)
    # w2:      (H, H2)        f32
    # slab:    (2, H+2*H2)    f32   row0 = [b1 | b2 | w3], row1[0] = b3
    # out:     (1, 1)         f32   in SMEM
    db = base_ref.shape[1]
    h = w1_ref.shape[1]
    h2 = w2_ref.shape[1]

    slab = slab_ref[...]                      # one full-vreg (2, 128) load
    b1 = slab[0:1, 0:h]                       # (1, H)
    b2 = slab[0:1, h:h + h2]                  # (1, H2)
    w3 = slab[0:1, h + h2:h + 2 * h2]         # (1, H2)
    b3 = slab[1:2, 0:1]                       # (1, 1)

    # Layer 1: concat([base, weather], -1) @ w1 folded into two MXU pushes
    # accumulating into the same f32 result (no host-side concatenate).
    h1 = (jnp.dot(base_ref[...], w1_ref[0:db, :],
                  preferred_element_type=jnp.float32)
          + jnp.dot(weather_ref[...], w1_ref[db:, :],
                    preferred_element_type=jnp.float32)
          + b1)
    h1 = jnp.maximum(h1, 0.0)

    # Layer 2: Linear + ReLU.
    h2a = jnp.dot(h1, w2_ref[...], preferred_element_type=jnp.float32) + b2
    h2a = jnp.maximum(h2a, 0.0)

    # Layer 3: Linear(H2 -> 1) as elementwise mul + lane reduction
    # (avoids a degenerate N=1 MXU matmul).
    z = jnp.sum(h2a * w3, axis=-1, keepdims=True) + b3      # (B, 1)

    # BCE(sigmoid(z), zeros) = -log(1 - sigmoid(z)) = softplus(z),
    # clamped at 100 to match PyTorch BCELoss's log clamp at -100.
    softplus = jnp.maximum(z, 0.0) + jnp.log(1.0 + jnp.exp(-jnp.abs(z)))
    out_ref[0, 0] = jnp.mean(jnp.minimum(softplus, 100.0))


def adversarial_independence_loss(base_embedding, weather_embedding, params):
    """Encoder adversarial loss (what the PyTorch forward returns)."""
    w1, w2, slab = params
    base_embedding = base_embedding.astype(jnp.float32)
    weather_embedding = weather_embedding.astype(jnp.float32)

    b, db = base_embedding.shape
    _, dw = weather_embedding.shape
    h = w1.shape[1]
    h2 = w2.shape[1]

    flops = 2 * b * ((db + dw) * h + h * h2 + h2) + 6 * b * (h + h2)
    bytes_accessed = 4 * (b * (db + dw) + (db + dw) * h + h * h2
                          + slab.size + 1)

    loss = pl.pallas_call(
        _disc_encoder_loss_kernel,
        out_shape=jax.ShapeDtypeStruct((1, 1), jnp.float32),
        in_specs=[
            pl.BlockSpec(memory_space=pltpu.MemorySpace.VMEM),   # base
            pl.BlockSpec(memory_space=pltpu.MemorySpace.VMEM),   # weather
            pl.BlockSpec(memory_space=pltpu.MemorySpace.VMEM),   # w1
            pl.BlockSpec(memory_space=pltpu.MemorySpace.VMEM),   # w2
            pl.BlockSpec(memory_space=pltpu.MemorySpace.VMEM),   # bias/w3 slab
        ],
        out_specs=pl.BlockSpec(memory_space=pltpu.MemorySpace.SMEM),
        cost_estimate=pl.CostEstimate(
            flops=int(flops),
            transcendentals=int(2 * b),
            bytes_accessed=int(bytes_accessed)),
    )(base_embedding, weather_embedding, w1, w2, slab)
    return loss[0, 0]


def init_discriminator_params(key, base_dim, weather_dim, hidden_dim=64):
    """Deterministic init mimicking torch.nn.Linear default
    (U[-1/sqrt(fan_in), 1/sqrt(fan_in)]). All parameters f32. The small
    vectors (b1, b2, w3, b3) are packed into one lane-dense slab so the kernel
    takes 5 operands total."""
    h2 = hidden_dim // 2
    input_dim = base_dim + weather_dim
    k1, k2, k3, k4, k5, k6 = jax.random.split(key, 6)

    def u(k, shape, fan_in):
        bound = 1.0 / jnp.sqrt(fan_in)
        return jax.random.uniform(k, shape, jnp.float32, -bound, bound)

    w1 = u(k1, (input_dim, hidden_dim), input_dim)     # (Db+Dw, H)
    b1 = u(k2, (hidden_dim,), input_dim)               # (H,)
    w2 = u(k3, (hidden_dim, h2), hidden_dim)           # (H, H2)
    b2 = u(k4, (h2,), hidden_dim)                      # (H2,)
    w3 = u(k5, (h2,), h2)                              # (H2,)  final Linear row
    b3 = u(k6, (1,), h2)                               # ()

    # Lane-dense slab: row 0 = [b1 | b2 | w3] (H + 2*H2 lanes), row 1[0] = b3.
    slab = jnp.zeros((2, hidden_dim + 2 * h2), jnp.float32)
    slab = slab.at[0, :hidden_dim].set(b1)
    slab = slab.at[0, hidden_dim:hidden_dim + h2].set(b2)
    slab = slab.at[0, hidden_dim + h2:].set(w3)
    slab = slab.at[1, 0].set(b3[0])
    return (w1, w2, slab)


def _reference_loss(base, weather, params):
    """Pure-JAX f32 reference of the same forward (eval-mode dropout), using
    the PyTorch-style sigmoid + log(1-p) + clamp(-100) formulation."""
    w1, w2, slab = params
    h = w1.shape[1]
    h2 = w2.shape[1]
    b1 = slab[0, :h]
    b2 = slab[0, h:h + h2]
    w3 = slab[0, h + h2:h + 2 * h2]
    b3 = slab[1, 0]

    x = jnp.concatenate([base, weather], axis=-1)
    a1 = jnp.maximum(jnp.dot(x, w1) + b1, 0.0)
    a2 = jnp.maximum(jnp.dot(a1, w2) + b2, 0.0)
    z = jnp.dot(a2, w3) + b3
    p = jax.nn.sigmoid(z)
    return -jnp.mean(jnp.maximum(jnp.log(1.0 - p), -100.0))


if __name__ == "__main__":
    key = jax.random.PRNGKey(0)
    k_base, k_weather, k_params = jax.random.split(key, 3)

    batch = 8
    base_dim = 16
    weather_dim = 16
    hidden_dim = 64

    base_embedding = jax.random.normal(k_base, (batch, base_dim), jnp.float32)
    weather_embedding = jax.random.normal(k_weather, (batch, weather_dim),
                                          jnp.float32)
    params = init_discriminator_params(k_params, base_dim, weather_dim,
                                       hidden_dim)

    loss = adversarial_independence_loss(base_embedding, weather_embedding,
                                         params)
    loss = jax.block_until_ready(loss)

    ref = _reference_loss(base_embedding, weather_embedding, params)
    assert jnp.allclose(loss, ref, rtol=1e-4, atol=1e-5), (loss, ref)

    print("KERNEL_OK")
</pallas_src>

<mosaic_0001>
module attributes {stable_mosaic.version = 11 : i64} {
  func.func @_disc_encoder_loss_kernel(%arg0: memref<8x16xf32, #tpu.memory_space<vmem>>, %arg1: memref<8x16xf32, #tpu.memory_space<vmem>>, %arg2: memref<32x64xf32, #tpu.memory_space<vmem>>, %arg3: memref<64x32xf32, #tpu.memory_space<vmem>>, %arg4: memref<2x128xf32, #tpu.memory_space<vmem>>, %arg5: memref<1x1xf32, #tpu.memory_space<smem>>) attributes {dimension_semantics = [], scalar_prefetch = 0 : i64, scratch_operands = 0 : i64, tpu.core_type = #tpu.core_type<tc>} {
    %c0 = arith.constant 0 : index
    %c0_0 = arith.constant 0 : index
    %0 = vector.load %arg4[%c0, %c0_0] : memref<2x128xf32, #tpu.memory_space<vmem>>, vector<2x128xf32>
    %1 = vector.extract_strided_slice %0 {offsets = [0, 0], sizes = [1, 64], strides = [1, 1]} : vector<2x128xf32> to vector<1x64xf32>
    %2 = vector.extract_strided_slice %0 {offsets = [0, 64], sizes = [1, 32], strides = [1, 1]} : vector<2x128xf32> to vector<1x32xf32>
    %3 = vector.extract_strided_slice %0 {offsets = [0, 96], sizes = [1, 32], strides = [1, 1]} : vector<2x128xf32> to vector<1x32xf32>
    %4 = vector.extract_strided_slice %0 {offsets = [1, 0], sizes = [1, 1], strides = [1, 1]} : vector<2x128xf32> to vector<1x1xf32>
    %c0_1 = arith.constant 0 : index
    %c0_2 = arith.constant 0 : index
    %5 = vector.load %arg0[%c0_1, %c0_2] : memref<8x16xf32, #tpu.memory_space<vmem>>, vector<8x16xf32>
    %c0_3 = arith.constant 0 : index
    %c0_4 = arith.constant 0 : index
    %6 = vector.load %arg2[%c0_3, %c0_4] : memref<32x64xf32, #tpu.memory_space<vmem>>, vector<16x64xf32>
    %cst = arith.constant dense<0.000000e+00> : vector<8x64xf32>
    %7 = tpu.matmul %5, %6, %cst {dimension_numbers = #tpu.dot_dimension_numbers<[1], [0], [0], [1], [0, 0, 1, 1], [], []>} : vector<8x16xf32>, vector<16x64xf32>, vector<8x64xf32> -> vector<8x64xf32>
    %c0_5 = arith.constant 0 : index
    %c0_6 = arith.constant 0 : index
    %8 = vector.load %arg1[%c0_5, %c0_6] : memref<8x16xf32, #tpu.memory_space<vmem>>, vector<8x16xf32>
    %c16 = arith.constant 16 : index
    %c0_7 = arith.constant 0 : index
    %9 = vector.load %arg2[%c16, %c0_7] : memref<32x64xf32, #tpu.memory_space<vmem>>, vector<16x64xf32>
    %cst_8 = arith.constant dense<0.000000e+00> : vector<8x64xf32>
    %10 = tpu.matmul %8, %9, %cst_8 {dimension_numbers = #tpu.dot_dimension_numbers<[1], [0], [0], [1], [0, 0, 1, 1], [], []>} : vector<8x16xf32>, vector<16x64xf32>, vector<8x64xf32> -> vector<8x64xf32>
    %11 = arith.addf %7, %10 : vector<8x64xf32>
    %12 = vector.broadcast %1 : vector<1x64xf32> to vector<8x64xf32>
    %13 = arith.addf %11, %12 : vector<8x64xf32>
    %cst_9 = arith.constant 0.000000e+00 : f32
    %14 = vector.broadcast %cst_9 : f32 to vector<8x64xf32>
    %15 = arith.maximumf %13, %14 : vector<8x64xf32>
    %c0_10 = arith.constant 0 : index
    %c0_11 = arith.constant 0 : index
    %16 = vector.load %arg3[%c0_10, %c0_11] : memref<64x32xf32, #tpu.memory_space<vmem>>, vector<64x32xf32>
    %cst_12 = arith.constant dense<0.000000e+00> : vector<8x32xf32>
    %17 = tpu.matmul %15, %16, %cst_12 {dimension_numbers = #tpu.dot_dimension_numbers<[1], [0], [0], [1], [0, 0, 1, 1], [], []>} : vector<8x64xf32>, vector<64x32xf32>, vector<8x32xf32> -> vector<8x32xf32>
    %18 = vector.broadcast %2 : vector<1x32xf32> to vector<8x32xf32>
    %19 = arith.addf %17, %18 : vector<8x32xf32>
    %cst_13 = arith.constant 0.000000e+00 : f32
    %20 = vector.broadcast %cst_13 : f32 to vector<8x32xf32>
    %21 = arith.maximumf %19, %20 : vector<8x32xf32>
    %22 = vector.broadcast %3 : vector<1x32xf32> to vector<8x32xf32>
    %23 = arith.mulf %21, %22 : vector<8x32xf32>
    %cst_14 = arith.constant dense<0.000000e+00> : vector<8xf32>
    %24 = vector.multi_reduction <add>, %23, %cst_14 [1] : vector<8x32xf32> to vector<8xf32>
    %25 = vector.shape_cast %24 : vector<8xf32> to vector<8x1xf32>
    %26 = vector.broadcast %4 : vector<1x1xf32> to vector<8x1xf32>
    %27 = arith.addf %25, %26 : vector<8x1xf32>
    %cst_15 = arith.constant 0.000000e+00 : f32
    %28 = vector.broadcast %cst_15 : f32 to vector<8x1xf32>
    %29 = arith.maximumf %27, %28 : vector<8x1xf32>
    %30 = math.absf %27 : vector<8x1xf32>
    %cst_16 = arith.constant 0.000000e+00 : f32
    %31 = vector.broadcast %cst_16 : f32 to vector<8x1xf32>
    %32 = arith.subf %31, %30 : vector<8x1xf32>
    %33 = math.exp %32 : vector<8x1xf32>
    %cst_17 = arith.constant 1.000000e+00 : f32
    %34 = vector.broadcast %cst_17 : f32 to vector<8x1xf32>
    %35 = arith.addf %34, %33 : vector<8x1xf32>
    %36 = math.log %35 : vector<8x1xf32>
    %37 = arith.addf %29, %36 : vector<8x1xf32>
    %cst_18 = arith.constant 1.000000e+02 : f32
    %38 = vector.broadcast %cst_18 : f32 to vector<8x1xf32>
    %39 = arith.minimumf %37, %38 : vector<8x1xf32>
    %40 = vector.shape_cast %39 : vector<8x1xf32> to vector<1x8x1xf32>
    %cst_19 = arith.constant dense<0.000000e+00> : vector<1xf32>
    %41 = vector.multi_reduction <add>, %40, %cst_19 [1, 2] : vector<1x8x1xf32> to vector<1xf32>
    %42 = vector.shape_cast %41 : vector<1xf32> to vector<1x1x1xf32>
    %43 = vector.extract %42[0, 0, 0] : f32 from vector<1x1x1xf32>
    %cst_20 = arith.constant 8.000000e+00 : f32
    %44 = arith.divf %43, %cst_20 : f32
    %c0_21 = arith.constant 0 : index
    %c0_22 = arith.constant 0 : index
    %45 = memref.load %arg5[%c0_21, %c0_22] : memref<1x1xf32, #tpu.memory_space<smem>>
    memref.store %44, %arg5[%c0_21, %c0_22] : memref<1x1xf32, #tpu.memory_space<smem>>
    return
  }
}

</mosaic_0001>

<bundles_post_ra>
// kernel: tpu_custom_call.1
= control target key start
LH: loop header
LB: loop body
LE: loop exit
PB: predicated region body
PF: predicated region fallthrough
CT: control target
= control target key end

     0   :  { %v413_v2 = vmov 0.0|0.0   ;;  %vm414_vm0 = vmmov 0   ;;  %v415_v4 = vmov 0.0   ;;  %s509_s0 = inlined_call_operand.vmem [shape: f32[8,16], index: 0, kind: input, shape index: {}]   ;;  %s510_s1 = inlined_call_operand.vmem [shape: f32[8,16], index: 1, kind: input, shape index: {}]   ;;  %s511_s2 = inlined_call_operand.vmem [shape: f32[32,64], index: 2, kind: input, shape index: {}]   ;;  %s512_s3 = inlined_call_operand.vmem [shape: f32[64,32], index: 3, kind: input, shape index: {}]   ;;  %s513_s4 = inlined_call_operand.vmem [shape: f32[2,128], index: 4, kind: input, shape index: {}]   ;;  %s514_s5 = inlined_call_operand.hbm [shape: f32[1,1], index: 5, kind: output, shape index: {}]  }
   0x1   :  { %v26_v0 = vld [vmem:[%s511_s2 + $0x10] sm:$0xff]  ;;  %v27_v1 = vld [vmem:[%s511_s2 + $0x18] sm:$0xff]  ;;  %371 = vmatprep.subr.bf16.mxu1 %v413_v2  ;;  %342 = vmatprep.mubr.msk.f32.mxu1 %vm414_vm0, %v415_v4  ;;  %v23_v5 = vld [vmem:[%s511_s2] sm:$0xff] }
   0x2   :  { %v372_v3 = vpack.c.bf16 %v27_v1, %v26_v0  ;;  %v24_v6 = vld [vmem:[%s511_s2 + $0x8] sm:$0xff]  ;;  %377 = vmatprep.subr.bf16.mxu0 %v413_v2  ;;  %v181_v7 = vld [vmem:[%s512_s3] sm:$0xff]  ;;  %368 = vmatprep.mubr.msk.f32.mxu0 %vm414_vm0, %v415_v4 }
   0x3   :  { %v182_v8 = vld [vmem:[%s512_s3 + $0x8] sm:$0xff] }
   0x4   :  { %10 = vsyncpa [#allocation3], 0  ;;  %373 = vmatpush3.bf16.msra.mxu1 %v372_v3  ;;  %v25_v9 = vld [vmem:[%s510_s1] sm:$0xff]  ;;  %vm28_vm1 = vcmask 130048   ;;  %v375_v10 = vpack.c.bf16 %v24_v6, %v23_v5  ;;  %v378_v11 = vpack.c.bf16 %v182_v8, %v181_v7  ;;  %v183_v13 = vld [vmem:[%s512_s3 + $0x10] sm:$0xff]  ;;  %v175_v16 = vlaneseq  ;;  %s416_s20 = smov 64  }
   0x5   :  { %374 = vmatprep.subr.bf16.mxu1 %v413_v2  ;;  %v22_v12 = vld [vmem:[%s509_s0] sm:$0xff]  ;;  %v184_v14 = vld [vmem:[%s512_s3 + $0x18] sm:$0xff]  ;;  %v186_v18 = vld [vmem:[%s512_s3 + $0x28] sm:$0xff]  ;;  %s417_s21 = smov 32   ;;  %vm193_vm2 = vcmask 523264   ;;  %vm272_vm3 = vcmask 261120  }
   0x6   :  { %379 = vmatpush3.bf16.msra.mxu0 %v378_v11  ;;  %v381_v15 = vpack.c.bf16 %v184_v14, %v183_v13  ;;  %v185_v17 = vld [vmem:[%s512_s3 + $0x20] sm:$0xff]  ;;  %v176_v19 = vshrl.u32 %v175_v16, 7  ;;  %v187_v21 = vld [vmem:[%s512_s3 + $0x30] sm:$0xff]  ;;  %v188_v22 = vld [vmem:[%s512_s3 + $0x38] sm:$0xff]  ;;  %vm291_vm4 = vcmask 7168   ;;  %s401_s24 = scalar_lea.hbm %s514_s5, 16 }
   0x7   :  { %343 = vmatmul.mubr.msk.f32.vlgmr.msra.gmra.mrb[0].mxu1 %vm28_vm1, %v25_v9  ;;  %380 = vmatprep.subr.bf16.mxu0 %v413_v2  ;;  %v384_v20 = vpack.c.bf16 %v186_v18, %v185_v17  ;;  %v387_v24 = vpack.c.bf16 %v188_v22, %v187_v21  ;;  %v21_v25 = vld [vmem:[%s513_s4] sm:$0x3]  ;;  %p402_p0 = scmp.ne.s32.totalorder %s514_s5, %s401_s24  ;;  %p405_p1 = scmp.lt.u32.totalorder %s401_s24, %s514_s5 }
   0x8   :  { %376 = vmatpush3.bf16.msra.mxu1 %v375_v10  ;;  %349 = vmatprep.mubr.msk.f32.mxu1 %vm414_vm0, %v415_v4  ;;  %v177_v23 = vsub.s32 0, %v176_v19  ;;  %v278_v42 = vsub.s32 1, %v176_v19 }
   0x9   :  { %p407_p2 = pnand %p405_p1, %p402_p0 }
   0xa   :  { %382 = vmatpush3.bf16.msra.mxu0 %v381_v15  ;;  %v178_v26 = vrot.slane %v21_v25, %v177_v23  ;;  %v279_v43 = vrot.slane %v21_v25, %v278_v42 }
   0xb   :  { %350 = vmatmul.mubr.msk.f32.vlgmr.msra.gmra.mrb[2].mxu1 %vm28_vm1, %v22_v12  ;;  %383 = vmatprep.subr.bf16.mxu0 %v413_v2 }
   0xc   :  { %190 = vrot.lane.b32.xlu0 %v178_v26, %s416_s20 }
   0xe   :  { %385 = vmatpush3.bf16.msra.mxu0 %v384_v20 }
   0xf   :  { %386 = vmatprep.subr.bf16.mxu0 %v413_v2 }
  0x10   :  { %268 = vrot.lane.b32.xlu0 %v178_v26, %s417_s21 }
  0x12   :  { %388 = vmatpush3.bf16.msra.mxu0 %v387_v24 }
  0x7e   :  { %v191_v34 = vpop.permute.xlu0 %190 }
  0x82   :  { %v269_v38 = vpop.permute.xlu0 %268 }
  0xda   :  { %v98_v27 = vpop.f32.mrb[0].mxu1 }
  0xdb   :  { %v344_v28 = vpop.f32.mrb[1].mxu1 }
  0xde   :  { %v171_v29 = vpop.f32.mrb[2].mxu1 }
  0xdf   :  { %v172_v30 = vadd.f32 %v171_v29, %v98_v27  ;;  %v351_v31 = vpop.f32.mrb[3].mxu1 }
  0xe1   :  { %v179_v32 = vadd.f32 %v178_v26, %v172_v30 }
  0xe3   :  { %v180_v33 = vmax.f32 %v179_v32, 0.0 }
  0xe5   :  { %369 = vmatmul.mubr.msk.f32.vlgmr.msra.gmra.mrb[0].mxu0 %vm193_vm2, %v180_v33 }
 0x1b8   :  { %v263_v35 = vpop.f32.mrb[0].mxu0 }
 0x1b9   :  { %v264_v36 = vadd.f32 %v263_v35, %v191_v34  ;;  %v370_v37 = vpop.f32.mrb[1].mxu0 }
 0x1bb   :  { %v267_v39 = vmax.f32 %v264_v36, 0.0 }
 0x1bd   :  { %v271_v40 = vmul.f32 %v269_v38, %v267_v39 }
 0x1bf   :  { %v273_v41 = vsel %vm272_vm3, %v271_v40, 0.0 }
 0x1c0   :  { %274 = vadd.xlane.f32.xlu1 %v273_v41 }
 0x24d   :  { %v275_v44 = vpop.xlane.xlu1 %274 }
 0x24e   :  { %v280_v45 = vadd.f32 %v279_v43, %v275_v44 }
 0x250   :  { %v282_v46 = vand.u32 2147483647, %v280_v45  ;;  %v281_v52 = vmax.f32 %v280_v45, 0.0 }
 0x252   :  { %v283_v47 = vsub.f32 0.0, %v282_v46 }
 0x254   :  { %v284_v48 = vmul.f32 1.442695, %v283_v47 }
 0x256   :  { %397 = vpow2.f32 %v284_v48 }
 0x260   :  { %v398_v49 = vpop.eup %397 }
 0x261   :  { %v286_v50 = vadd.f32 1.0, %v398_v49 }
 0x263   :  { %399 = vlog2.f32 %v286_v50 }
 0x26d   :  { %v400_v51 = vpop.eup %399 }
 0x26e   :  { %v288_v53 = vmul.f32 0.6931472, %v400_v51 }
 0x270   :  { %v289_v54 = vadd.f32 %v288_v53, %v281_v52 }
 0x272   :  { %v290_v55 = vmin.f32 %v289_v54, 100.0 }
 0x274   :  { %v292_v56 = vsel %vm291_vm4, %v290_v55, 0.0 }
 0x275   :  { %293 = vadd.xlane.f32.xlu1 %v292_v56 }
 0x302   :  { %v294_v57 = vpop.xlane.xlu1 %293 }
 0x303   :  { %v295_v58 = vrot.slane %v294_v57, 4 }
 0x305   :  { %v296_v59 = vadd.f32 %v295_v58, %v294_v57 }
 0x307   :  { %v297_v60 = vrot.slane %v296_v59, 2 }
 0x309   :  { %v298_v61 = vadd.f32 %v297_v60, %v296_v59 }
 0x30b   :  { %v299_v62 = vrot.slane %v298_v61, 1 }
 0x30d   :  { %v300_v63 = vadd.f32 %v299_v62, %v298_v61 }
 0x30f   :  { %389 = vpush %v300_v63 }
 0x340   :  { %s390_s3 = spop %389 }
 0x341   :  { %s304_s4 = smul.f32 0.125, %s390_s3 }
 0x343   :  { %306 = sst [smem:[#allocation2]] %s304_s4 }
 0x344   :  { %410 = shalt.err (!%p407_p2)
}
 0x345   :  { %s418_s29 = smov [#allocation2]  }
 0x346   :  { %314 = dma.smem_to_hbm %s418_s29, 16, %s514_s5, [#allocation3]  }
 0x347   :  { %411 = dma.done.wait [#allocation3], 16  }
 0x348   :  { %412 = vsyncadd [#allocation3], 4294967280 }
 0x349   :  { %318 = sfence }
 0x34a   :  { %319 = vsyncpa [#allocation3], 1 }

</bundles_post_ra>
